<compile_context>
chip_gen: v7x
topology: tpu7x:2x2x1
jax: 0.10.0
libtpu: 0.0.40
codegen_flags: <defaults>
</compile_context>

<pallas_src>
import jax
import jax.numpy as jnp
from jax.experimental import pallas as pl
from jax.experimental.pallas import tpu as pltpu


def _round_up(x, m):
    return ((x + m - 1) // m) * m


def _cdiv(a, b):
    return (a + b - 1) // b


def _spec(block_shape, index_map, buffers=None):
    """pl.BlockSpec with an optional explicit buffer count (compat-guarded)."""
    if buffers is None:
        return pl.BlockSpec(block_shape, index_map)
    try:
        return pl.BlockSpec(block_shape, index_map,
                            pipeline_mode=pl.Buffered(buffers))
    except (TypeError, AttributeError):
        # Older jax: fall back to the default (double-buffered) pipeline.
        return pl.BlockSpec(block_shape, index_map)


def _target_selector_kernel(x_ref, w_ref, b_ref, o_ref):
    # x_ref : (seq_len, tn)   lane tile of the packed selected channels
    # w_ref : (tp, seq_len)   pred-row tile of the time-mixing weights
    # b_ref : (tp, 1)         bias rows for this pred tile
    # o_ref : (tp, tn)        lane-dense output tile
    o_ref[...] = (
        jnp.dot(w_ref[...], x_ref[...], preferred_element_type=jnp.float32)
        + b_ref[...]
    ).astype(o_ref.dtype)


def target_selector_forward(x_enc, x_mark_enc, x_dec, x_mark_dec,
                            W, bias, target_indices, mask=None,
                            lane_tile=1024, pred_tile=256,
                            compute_dtype=jnp.float32):
    """Pallas implementation of TargetSelector.forward.

    Call this under jax.jit (with `target_indices`, `lane_tile`, `pred_tile`,
    `compute_dtype` static) so the wrapper-side gather/transpose/reshape and
    the final unpack fuse with the pallas_call.

    x_enc: [B, seq_len, n_feat]  W: [pred_len, seq_len]  bias: [pred_len]
    target_indices: static tuple/list of python ints.
    returns: [B, pred_len, n_tgt] float32
    """
    B, seq_len, n_feat = x_enc.shape
    pred_len = W.shape[0]
    target_indices = tuple(int(i) for i in target_indices)   # must be static
    n_tgt = len(target_indices)
    idx = jnp.asarray(target_indices, dtype=jnp.int32)
    N = B * n_tgt

    # --- Gather target channels directly into the packed [seq, B*n_tgt] layout.
    # (selection commutes with channel-independent time mixing; under jit the
    # transpose + take + reshape fuse into a single copy.)
    x_t = jnp.transpose(x_enc.astype(compute_dtype), (1, 0, 2))   # [seq, B, feat]
    X = jnp.take(x_t, idx, axis=2).reshape(seq_len, N)            # [seq, B*n_tgt]

    Wc = W.astype(compute_dtype)
    bias2d = bias.reshape(pred_len, 1).astype(jnp.float32)

    # --- Tile selection (no padding of X: Pallas masks the edge block). ------
    tn = min(lane_tile, _round_up(N, 128))          # lane tile, multiple of 128
    n_lane_blocks = _cdiv(N, tn)
    tp = min(pred_tile, _round_up(pred_len, 8))     # pred-row tile, multiple of 8
    if n_lane_blocks == 1 and pred_len >= 16:
        # v7x has 2 TensorCores: keep >=2 parallel programs when the lane axis
        # collapses into a single tile.
        tp = min(tp, _round_up(_cdiv(pred_len, 2), 8))
    n_pred_blocks = _cdiv(pred_len, tp)

    grid = (n_pred_blocks, n_lane_blocks)

    itemsize = jnp.dtype(compute_dtype).itemsize
    cost = pl.CostEstimate(
        flops=2 * pred_len * seq_len * N,
        transcendentals=0,
        bytes_accessed=(seq_len * N * itemsize          # X read
                        + pred_len * seq_len * itemsize  # W read
                        + pred_len * 4                   # bias read
                        + pred_len * N * 4),             # O write
    )

    out_packed = pl.pallas_call(
        _target_selector_kernel,
        out_shape=jax.ShapeDtypeStruct((pred_len, N), jnp.float32),
        grid=grid,
        in_specs=[
            _spec((seq_len, tn), lambda i, j: (0, j)),               # X lane tile
            _spec((tp, seq_len), lambda i, j: (i, 0), buffers=1),    # W row tile (single-buffered)
            _spec((tp, 1), lambda i, j: (i, 0), buffers=1),          # bias rows (single-buffered)
        ],
        out_specs=pl.BlockSpec((tp, tn), lambda i, j: (i, j)),
        compiler_params=pltpu.CompilerParams(
            dimension_semantics=("parallel", "parallel")),
        cost_estimate=cost,
    )(X, Wc, bias2d)

    # --- Unpack back to [B, pred_len, n_tgt] (fused layout plumbing under jit).
    out = jnp.transpose(out_packed.reshape(pred_len, B, n_tgt), (1, 0, 2))
    return out


def _reference_forward(x_enc, W, bias, target_indices):
    # Pure-JAX reference of (inner model + post-hoc selection) for verification.
    full = jnp.einsum('ts,bsf->btf', W, x_enc) + bias[None, :, None]
    return full[:, :, jnp.asarray(list(target_indices))]


if __name__ == "__main__":
    key = jax.random.PRNGKey(0)

    # Small shapes consistent with the time-series forward signature.
    B, seq_len, pred_len, n_feat = 2, 8, 8, 4
    input_features = ["HUFL", "HULL", "MUFL", "MULL"]
    target_features = ["HUFL", "MUFL"]
    target_indices = tuple(input_features.index(f) for f in target_features)  # (0, 2)

    k1, k2, k3, k4, k5, k6 = jax.random.split(key, 6)
    x_enc = jax.random.normal(k1, (B, seq_len, n_feat), dtype=jnp.float32)
    x_mark_enc = jax.random.normal(k2, (B, seq_len, 4), dtype=jnp.float32)
    x_dec = jax.random.normal(k3, (B, pred_len, n_feat), dtype=jnp.float32)
    x_mark_dec = jax.random.normal(k4, (B, pred_len, 4), dtype=jnp.float32)

    # Deterministic inner-model parameters (linear time-mixing forecaster).
    W = jax.random.normal(k5, (pred_len, seq_len), dtype=jnp.float32) * 0.1
    bias = jax.random.normal(k6, (pred_len,), dtype=jnp.float32) * 0.01

    fwd = jax.jit(
        target_selector_forward,
        static_argnames=("target_indices", "lane_tile", "pred_tile",
                         "compute_dtype"),
    )
    out = fwd(x_enc, x_mark_enc, x_dec, x_mark_dec, W, bias,
              target_indices=target_indices)
    out = jax.block_until_ready(out)

    ref = _reference_forward(x_enc, W, bias, target_indices)
    assert out.shape == (B, pred_len, len(target_indices))
    assert jnp.allclose(out, ref, atol=1e-5, rtol=1e-5), "mismatch vs reference"

    print("KERNEL_OK")
</pallas_src>

<mosaic_0001>
module attributes {stable_mosaic.version = 11 : i64} {
  func.func @_target_selector_kernel(%arg0: i32, %arg1: i32, %arg2: memref<8x128xf32, #tpu.memory_space<vmem>>, %arg3: memref<8x8xf32, #tpu.memory_space<vmem>>, %arg4: memref<8x1xf32, #tpu.memory_space<vmem>>, %arg5: memref<8x128xf32, #tpu.memory_space<vmem>>) attributes {dimension_semantics = [#tpu.dimension_semantics<parallel>, #tpu.dimension_semantics<parallel>], iteration_bounds = array<i64: 1, 1>, scalar_prefetch = 0 : i64, scratch_operands = 0 : i64, tpu.core_type = #tpu.core_type<tc>, window_params = [{transform_indices = @transform_0, window_bounds = array<i64: 8, 128>}, {pipeline_mode = #tpu.pipeline_mode<synchronous>, transform_indices = @transform_1, window_bounds = array<i64: 8, 8>}, {pipeline_mode = #tpu.pipeline_mode<synchronous>, transform_indices = @transform_2, window_bounds = array<i64: 8, 1>}, {transform_indices = @transform_3, window_bounds = array<i64: 8, 128>}]} {
    %c0 = arith.constant 0 : index
    %c0_0 = arith.constant 0 : index
    %0 = vector.load %arg3[%c0, %c0_0] : memref<8x8xf32, #tpu.memory_space<vmem>>, vector<8x8xf32>
    %c0_1 = arith.constant 0 : index
    %c0_2 = arith.constant 0 : index
    %1 = vector.load %arg2[%c0_1, %c0_2] : memref<8x128xf32, #tpu.memory_space<vmem>>, vector<8x128xf32>
    %cst = arith.constant dense<0.000000e+00> : vector<8x128xf32>
    %2 = tpu.matmul %0, %1, %cst {dimension_numbers = #tpu.dot_dimension_numbers<[1], [0], [0], [1], [0, 0, 1, 1], [], []>} : vector<8x8xf32>, vector<8x128xf32>, vector<8x128xf32> -> vector<8x128xf32>
    %c0_3 = arith.constant 0 : index
    %c0_4 = arith.constant 0 : index
    %3 = vector.load %arg4[%c0_3, %c0_4] : memref<8x1xf32, #tpu.memory_space<vmem>>, vector<8x1xf32>
    %4 = vector.broadcast %3 : vector<8x1xf32> to vector<8x128xf32>
    %5 = arith.addf %2, %4 : vector<8x128xf32>
    %c0_5 = arith.constant 0 : index
    %c0_6 = arith.constant 0 : index
    %6 = vector.load %arg5[%c0_5, %c0_6] : memref<8x128xf32, #tpu.memory_space<vmem>>, vector<8x128xf32>
    tpu.vector_store %arg5[%c0_5, %c0_6], %5 {strides = array<i32>} : memref<8x128xf32, #tpu.memory_space<vmem>>, vector<8x128xf32>,
    return
  }
  func.func @transform_0(%arg0: i32, %arg1: i32) -> (i32, i32) {
    %c0_i32 = arith.constant 0 : i32
    %c0_i32_0 = arith.constant 0 : i32
    return %c0_i32, %arg1 : i32, i32
  }
  func.func @transform_1(%arg0: i32, %arg1: i32) -> (i32, i32) {
    %c0_i32 = arith.constant 0 : i32
    %c0_i32_0 = arith.constant 0 : i32
    return %arg0, %c0_i32 : i32, i32
  }
  func.func @transform_2(%arg0: i32, %arg1: i32) -> (i32, i32) {
    %c0_i32 = arith.constant 0 : i32
    %c0_i32_0 = arith.constant 0 : i32
    return %arg0, %c0_i32 : i32, i32
  }
  func.func @transform_3(%arg0: i32, %arg1: i32) -> (i32, i32) {
    %c0_i32 = arith.constant 0 : i32
    return %arg0, %arg1 : i32, i32
  }
}

</mosaic_0001>

<bundles_post_ra>
// kernel: target_selector_forward.1
= control target key start
LH: loop header
LB: loop body
LE: loop exit
PB: predicated region body
PF: predicated region fallthrough
CT: control target
= control target key end

     0   :  { %vm22_vm0 = vcmask 64512   ;;  %v113_v0 = vmov 0.0   ;;  %vm114_vm1 = vmmov 0   ;;  %v115_v4 = vmov 0   ;;  %s148_s0 = inlined_call_operand.vmem [shape: f32[8,4], index: 0, kind: input, shape index: {}]   ;;  %s149_s1 = inlined_call_operand.vmem [shape: f32[8,8], index: 1, kind: input, shape index: {}]   ;;  %s150_s2 = inlined_call_operand.vmem [shape: f32[8,1], index: 2, kind: input, shape index: {}]   ;;  %s151_s3 = inlined_call_operand.vmem [shape: f32[8,4], index: 3, kind: output, shape index: {}]  }
   0x1   :  { %104 = vmatprep.subr.mxu0 %v113_v0  ;;  %v15_v1 = vld [vmem:[%s148_s0] sm:$0xff]  ;;  %106 = vmatprep.mubr.msk.f32.mxu0 %vm114_vm1, %v113_v0 }
   0x2   :  { %v14_v2 = vld [vmem:[%s149_s1] sm:$0xff]  ;;  %105 = vmatpush3.msra.mxu0 %v15_v1  ;;  %112 = vset.pattern.permute.xlu0 %v115_v4 }
   0x3   :  { %v16_v3 = vld [vmem:[%s150_s2] sm:$0xff]  ;;  %107 = vmatmul.mubr.msk.f32.vlgmr.msra.gmra.mrb[0].mxu0 %vm22_vm0, %v14_v2 }
   0x4   :  { %19 = vperm.xlu0 %112, %v16_v3  }
  0x83   :  { %v20_v5 = vpop.permute.xlu0 %19 }
  0xd6   :  { %v92_v6 = vpop.f32.mrb[0].mxu0 }
  0xd7   :  { %v93_v7 = vadd.f32 %v92_v6, %v20_v5  ;;  %v108_v8 = vpop.f32.mrb[1].mxu0 }
  0xd9   :  { %96 = vst [vmem:[%s151_s3] sm:$0xff] %v93_v7 }

</bundles_post_ra>
